<compile_context>
chip_gen: v5e
topology: v5e:2x2
jax: 0.10.0
libtpu: 0.0.40
codegen_flags: <defaults>
</compile_context>

<pallas_src>
import jax
import jax.numpy as jnp
from jax.experimental import pallas as pl
from jax.experimental.pallas import tpu as pltpu

EPS = 1e-6
NEG_INF = -1e30


# ------------------- Kernel 1: fused RMSNorm(norm1) + QKV --------------------
def _norm_qkv_kernel(x_ref, w_ref, wqkv_ref, bqkv_ref, o_ref):
    x = x_ref[...].astype(jnp.float32)
    var = jnp.mean(x * x, axis=-1, keepdims=True)
    h = (x * jax.lax.rsqrt(var + EPS) * w_ref[...]).astype(jnp.bfloat16)
    qkv = jnp.dot(h, wqkv_ref[...], preferred_element_type=jnp.float32)
    o_ref[...] = (qkv + bqkv_ref[...]).astype(o_ref.dtype)


def norm_qkv(x, norm1_w, qkv_w, qkv_b, *, tq):
    N, D = x.shape
    threeD = qkv_w.shape[1]
    return pl.pallas_call(
        _norm_qkv_kernel,
        out_shape=jax.ShapeDtypeStruct((N, threeD), jnp.bfloat16),
        grid_spec=pltpu.PrefetchScalarGridSpec(
            num_scalar_prefetch=0,
            grid=(N // tq,),
            in_specs=[
                pl.BlockSpec((tq, D), lambda i: (i, 0)),       # x row tile
                pl.BlockSpec((1, D), lambda i: (0, 0)),        # norm1 weight
                pl.BlockSpec((D, threeD), lambda i: (0, 0)),   # qkv weight (resident)
                pl.BlockSpec((1, threeD), lambda i: (0, 0)),   # qkv bias
            ],
            out_specs=pl.BlockSpec((tq, threeD), lambda i: (i, 0)),
        ),
        compiler_params=pltpu.CompilerParams(dimension_semantics=("parallel",)),
    )(x, norm1_w.reshape(1, -1), qkv_w, qkv_b.reshape(1, -1))


# --- Kernel 2: flash attention + fused output projection + residual add ------
def _attn_kernel(q_ref, k_ref, v_ref, segq_ref, segk_ref, pw_ref, pb_ref,
                 res_ref, o_ref, m_scr, l_scr, acc_scr):
    h = pl.program_id(1)
    kv = pl.program_id(2)
    n_kv = pl.num_programs(2)

    # initialize the resident (tq, D) output block with residual + proj bias
    @pl.when(jnp.logical_and(h == 0, kv == 0))
    def _():
        o_ref[...] = res_ref[...] + pb_ref[...]

    # reset online-softmax state at the start of each head's KV sweep
    @pl.when(kv == 0)
    def _():
        m_scr[...] = jnp.full(m_scr.shape, -jnp.inf, jnp.float32)
        l_scr[...] = jnp.zeros(l_scr.shape, jnp.float32)
        acc_scr[...] = jnp.zeros(acc_scr.shape, jnp.float32)

    q = q_ref[0]          # (tq, Dh) bf16, RoPE + 1/sqrt(Dh) already applied
    k = k_ref[0]          # (tkv, Dh) bf16, RoPE already applied
    v = v_ref[0]          # (tkv, Dh) bf16

    s = jax.lax.dot_general(q, k, (((1,), (1,)), ((), ())),
                            preferred_element_type=jnp.float32)   # (tq, tkv)
    mask = segq_ref[...] == segk_ref[...]                         # (tq, tkv)
    s = jnp.where(mask, s, NEG_INF)

    m_prev = m_scr[...]
    m_new = jnp.maximum(m_prev, jnp.max(s, axis=-1, keepdims=True))
    alpha = jnp.exp(m_prev - m_new)
    p = jnp.exp(s - m_new)
    l_scr[...] = alpha * l_scr[...] + jnp.sum(p, axis=-1, keepdims=True)
    acc_scr[...] = alpha * acc_scr[...] + jnp.dot(
        p.astype(v.dtype), v, preferred_element_type=jnp.float32)
    m_scr[...] = m_new

    # last KV tile for this head: normalize and fold in this head's slice of
    # the output projection, accumulating into the lane-dense (tq, D) output.
    @pl.when(kv == n_kv - 1)
    def _():
        o_h = acc_scr[...] * pl.reciprocal(l_scr[...], approx=True)
        o_ref[...] += jnp.dot(o_h.astype(jnp.bfloat16), pw_ref[0],
                              preferred_element_type=jnp.float32)


def attention_proj_residual(q, k, v, seg_row, seg_col, proj_w_h, proj_b, res,
                            *, tq, tkv):
    H, N, Dh = q.shape
    D = res.shape[1]
    return pl.pallas_call(
        _attn_kernel,
        out_shape=jax.ShapeDtypeStruct((N, D), jnp.float32),
        grid_spec=pltpu.PrefetchScalarGridSpec(
            num_scalar_prefetch=0,
            grid=(N // tq, H, N // tkv),
            in_specs=[
                pl.BlockSpec((1, tq, Dh), lambda i, h, j: (h, i, 0)),    # q
                pl.BlockSpec((1, tkv, Dh), lambda i, h, j: (h, j, 0)),   # k
                pl.BlockSpec((1, tkv, Dh), lambda i, h, j: (h, j, 0)),   # v
                pl.BlockSpec((tq, 1), lambda i, h, j: (i, 0)),           # seg rows
                pl.BlockSpec((1, tkv), lambda i, h, j: (0, j)),          # seg cols
                pl.BlockSpec((1, Dh, D), lambda i, h, j: (h, 0, 0)),     # proj_w[h]
                pl.BlockSpec((1, D), lambda i, h, j: (0, 0)),            # proj_b
                pl.BlockSpec((tq, D), lambda i, h, j: (i, 0)),           # residual
            ],
            out_specs=pl.BlockSpec((tq, D), lambda i, h, j: (i, 0)),
            scratch_shapes=[
                pltpu.VMEM((tq, 1), jnp.float32),    # running max
                pltpu.VMEM((tq, 1), jnp.float32),    # running sum
                pltpu.VMEM((tq, Dh), jnp.float32),   # unnormalized acc
            ],
        ),
        compiler_params=pltpu.CompilerParams(
            dimension_semantics=("parallel", "arbitrary", "arbitrary")),
    )(q, k, v, seg_row, seg_col, proj_w_h, proj_b.reshape(1, -1), res)


# ---------- Kernel 3: fused RMSNorm(norm2) + SwiGLU MLP + residual -----------
def _mlp_kernel(x_ref, w2_ref, gw_ref, gb_ref, uw_ref, ub_ref, dw_ref, db_ref,
                o_ref, h_scr):
    j = pl.program_id(1)

    @pl.when(j == 0)
    def _():
        x = x_ref[...].astype(jnp.float32)
        var = jnp.mean(x * x, axis=-1, keepdims=True)
        h = x * jax.lax.rsqrt(var + EPS) * w2_ref[...]
        h_scr[...] = h.astype(jnp.bfloat16)        # cache normed activations
        o_ref[...] = x_ref[...] + db_ref[...]      # residual + down bias

    h = h_scr[...]
    g = jnp.dot(h, gw_ref[...], preferred_element_type=jnp.float32) + gb_ref[...]
    u = jnp.dot(h, uw_ref[...], preferred_element_type=jnp.float32) + ub_ref[...]
    act = (g * jax.nn.sigmoid(g)) * u              # SiLU(gate) * up, f32
    o_ref[...] += jnp.dot(act.astype(jnp.bfloat16), dw_ref[...],
                          preferred_element_type=jnp.float32)


def mlp_norm_residual(x1, norm2_w, gate_w, gate_b, up_w, up_b, down_w, down_b,
                      *, tq, ti):
    N, D = x1.shape
    I = gate_w.shape[1]
    return pl.pallas_call(
        _mlp_kernel,
        out_shape=jax.ShapeDtypeStruct((N, D), jnp.float32),
        grid_spec=pltpu.PrefetchScalarGridSpec(
            num_scalar_prefetch=0,
            grid=(N // tq, I // ti),
            in_specs=[
                pl.BlockSpec((tq, D), lambda i, j: (i, 0)),    # x1 (norm in + res)
                pl.BlockSpec((1, D), lambda i, j: (0, 0)),     # norm2 weight
                pl.BlockSpec((D, ti), lambda i, j: (0, j)),    # gate_w column tile
                pl.BlockSpec((1, ti), lambda i, j: (0, j)),    # gate_b
                pl.BlockSpec((D, ti), lambda i, j: (0, j)),    # up_w column tile
                pl.BlockSpec((1, ti), lambda i, j: (0, j)),    # up_b
                pl.BlockSpec((ti, D), lambda i, j: (j, 0)),    # down_w row tile
                pl.BlockSpec((1, D), lambda i, j: (0, 0)),     # down_b
            ],
            out_specs=pl.BlockSpec((tq, D), lambda i, j: (i, 0)),
            scratch_shapes=[pltpu.VMEM((tq, D), jnp.bfloat16)],
        ),
        compiler_params=pltpu.CompilerParams(
            dimension_semantics=("parallel", "arbitrary")),
    )(x1, norm2_w.reshape(1, -1), gate_w, gate_b.reshape(1, -1),
      up_w, up_b.reshape(1, -1), down_w, down_b.reshape(1, -1))


# --------------------------- Full vision block ------------------------------
def qwen25_vision_block(x, cu_seqlens, cos, sin, p):
    """x: (S, B, D); cu_seqlens: (num_seqs+1,); cos/sin: (S*B, Dh)."""
    S, B, D = x.shape
    H = p['num_heads']
    Dh = D // H
    N = S * B
    I = p['gate_w'].shape[1]
    xf = x.reshape(N, D).astype(jnp.float32)

    # bf16 weights feed the MXU; accumulation stays f32 inside the kernels.
    dt = jnp.bfloat16
    qkv_w = p['qkv_w'].astype(dt)
    proj_w_h = p['proj_w'].reshape(H, Dh, D).astype(dt)   # per-head slices
    gate_w = p['gate_w'].astype(dt)
    up_w = p['up_w'].astype(dt)
    down_w = p['down_w'].astype(dt)

    # tile sizes (TODO(synk): pad N / I when they are not tile multiples)
    tq = min(128, N)
    tkv = min(128, N)
    ti = min(512, I)
    assert N % tq == 0 and N % tkv == 0 and I % ti == 0

    # --- fused norm1 + QKV projection ---
    qkv = norm_qkv(xf, p['norm1_w'], qkv_w, p['qkv_b'], tq=tq)    # (N, 3D) bf16

    def split_heads(t):
        return t.reshape(N, H, Dh).transpose(1, 0, 2)             # (H, N, Dh)

    q = split_heads(qkv[:, :D])
    k = split_heads(qkv[:, D:2 * D])
    v = split_heads(qkv[:, 2 * D:]).astype(dt)

    # RoPE applied ONCE here; XLA fuses it with the head-split transpose above,
    # so the attention kernel never re-computes it per head.  The 1/sqrt(Dh)
    # scale is folded into q so the kernel skips the NxN multiply.
    def rope(t):
        half = Dh // 2
        rot = jnp.concatenate([-t[..., half:], t[..., :half]], axis=-1)
        return t.astype(jnp.float32) * cos[None] + rot.astype(jnp.float32) * sin[None]

    scale = 1.0 / (Dh ** 0.5)
    q = (rope(q) * scale).astype(dt)
    k = rope(k).astype(dt)

    # per-token segment id (O(N)) -- replaces the materialized NxN mask.
    pos = jnp.arange(N, dtype=jnp.int32)
    seg = (jnp.searchsorted(cu_seqlens, pos, side='right') - 1).astype(jnp.float32)
    seg_row = seg.reshape(N, 1)
    seg_col = seg.reshape(1, N)

    # --- flash attention + output projection + residual (x1 = x + attn) ---
    x1 = attention_proj_residual(q, k, v, seg_row, seg_col, proj_w_h,
                                 p['proj_b'], xf, tq=tq, tkv=tkv)

    # --- fused norm2 + SwiGLU MLP + residual ---
    out = mlp_norm_residual(x1, p['norm2_w'], gate_w, p['gate_b'], up_w,
                            p['up_b'], down_w, p['down_b'], tq=tq, ti=ti)
    return out.reshape(S, B, D).astype(x.dtype)


# -------------------------- plain-JAX reference -----------------------------
def reference_block(x, cu_seqlens, cos, sin, p):
    S, B, D = x.shape
    H = p['num_heads']
    Dh = D // H
    N = S * B
    xf = x.reshape(N, D)

    def rms(t, w):
        var = jnp.mean(t * t, axis=-1, keepdims=True)
        return t * jax.lax.rsqrt(var + EPS) * w

    h = rms(xf, p['norm1_w'])
    qkv = h @ p['qkv_w'] + p['qkv_b']
    q, k, v = jnp.split(qkv, 3, -1)
    q = q.reshape(N, H, Dh).transpose(1, 0, 2)
    k = k.reshape(N, H, Dh).transpose(1, 0, 2)
    v = v.reshape(N, H, Dh).transpose(1, 0, 2)

    def rope(t):
        half = Dh // 2
        t1, t2 = t[..., :half], t[..., half:]
        rot = jnp.concatenate([-t2, t1], axis=-1)
        return t * cos[None] + rot * sin[None]

    q, k = rope(q), rope(k)
    pos = jnp.arange(N, dtype=jnp.int32)
    seg = jnp.searchsorted(cu_seqlens, pos, side='right') - 1
    bias = jnp.where(seg[:, None] == seg[None, :], 0.0, NEG_INF)
    s = jnp.einsum('hqd,hkd->hqk', q, k) / (Dh ** 0.5) + bias[None]
    pattn = jax.nn.softmax(s, axis=-1)
    o = jnp.einsum('hqk,hkd->hqd', pattn, v)
    o = o.transpose(1, 0, 2).reshape(N, D)
    x1 = xf + o @ p['proj_w'] + p['proj_b']
    h2 = rms(x1, p['norm2_w'])
    g = h2 @ p['gate_w'] + p['gate_b']
    u = h2 @ p['up_w'] + p['up_b']
    d = (g * jax.nn.sigmoid(g) * u) @ p['down_w'] + p['down_b']
    return (x1 + d).reshape(S, B, D)


# ---------------------------------- main -------------------------------------
if __name__ == "__main__":
    key = jax.random.PRNGKey(0)
    S, B, D, H, I = 256, 1, 128, 4, 1024     # seq, batch, dim, heads, intermediate
    Dh = D // H

    keys = jax.random.split(key, 14)
    init = lambda k, shape: 0.02 * jax.random.normal(k, shape, jnp.float32)

    params = {
        'num_heads': H,
        'norm1_w': 1.0 + init(keys[0], (D,)),
        'norm2_w': 1.0 + init(keys[1], (D,)),
        'qkv_w': init(keys[2], (D, 3 * D)),
        'qkv_b': init(keys[3], (3 * D,)),
        'proj_w': init(keys[4], (D, D)),
        'proj_b': init(keys[5], (D,)),
        'gate_w': init(keys[6], (D, I)),
        'gate_b': init(keys[7], (I,)),
        'up_w': init(keys[8], (D, I)),
        'up_b': init(keys[9], (I,)),
        'down_w': init(keys[10], (I, D)),
        'down_b': init(keys[11], (D,)),
    }

    x = jax.random.normal(keys[12], (S, B, D), jnp.float32)
    cu_seqlens = jnp.array([0, 64, 160, 256], dtype=jnp.int32)   # three sequences

    # rotary position embeddings (cos, sin) of shape (S*B, Dh), Qwen2.5-VL style
    inv_freq = 1.0 / (10000.0 ** (jnp.arange(0, Dh, 2, dtype=jnp.float32) / Dh))
    freqs = jnp.arange(S * B, dtype=jnp.float32)[:, None] * inv_freq[None, :]
    emb = jnp.concatenate([freqs, freqs], axis=-1)
    cos, sin = jnp.cos(emb), jnp.sin(emb)

    out = qwen25_vision_block(x, cu_seqlens, cos, sin, params)
    out = jax.block_until_ready(out)

    ref = reference_block(x, cu_seqlens, cos, sin, params)
    assert out.shape == (S, B, D)
    assert bool(jnp.all(jnp.isfinite(out)))
    max_err = float(jnp.max(jnp.abs(out - ref)))
    assert max_err < 2e-2, f"max abs error {max_err}"

    print("KERNEL_OK")
</pallas_src>

<mosaic_0001>
module attributes {stable_mosaic.version = 11 : i64} {
  func.func @_norm_qkv_kernel(%arg0: i32, %arg1: memref<128x128xf32, #tpu.memory_space<vmem>>, %arg2: memref<1x128xf32, #tpu.memory_space<vmem>>, %arg3: memref<128x384xbf16, #tpu.memory_space<vmem>>, %arg4: memref<1x384xf32, #tpu.memory_space<vmem>>, %arg5: memref<128x384xbf16, #tpu.memory_space<vmem>>) attributes {dimension_semantics = [#tpu.dimension_semantics<parallel>], iteration_bounds = array<i64: 2>, scalar_prefetch = 0 : i64, scratch_operands = 0 : i64, tpu.core_type = #tpu.core_type<tc>, window_params = [{transform_indices = @transform_0, window_bounds = array<i64: 128, 128>}, {pipeline_mode = #tpu.pipeline_mode<synchronous>, transform_indices = @transform_1, window_bounds = array<i64: 1, 128>}, {pipeline_mode = #tpu.pipeline_mode<synchronous>, transform_indices = @transform_2, window_bounds = array<i64: 128, 384>}, {pipeline_mode = #tpu.pipeline_mode<synchronous>, transform_indices = @transform_3, window_bounds = array<i64: 1, 384>}, {transform_indices = @transform_4, window_bounds = array<i64: 128, 384>}]} {
    %c0 = arith.constant 0 : index
    %c0_0 = arith.constant 0 : index
    %0 = vector.load %arg1[%c0, %c0_0] : memref<128x128xf32, #tpu.memory_space<vmem>>, vector<128x128xf32>
    %1 = arith.mulf %0, %0 : vector<128x128xf32>
    %cst = arith.constant dense<0.000000e+00> : vector<128xf32>
    %2 = vector.multi_reduction <add>, %1, %cst [1] : vector<128x128xf32> to vector<128xf32>
    %3 = vector.shape_cast %2 : vector<128xf32> to vector<128x1xf32>
    %cst_1 = arith.constant 1.280000e+02 : f32
    %4 = vector.broadcast %cst_1 : f32 to vector<128x1xf32>
    %5 = arith.divf %3, %4 : vector<128x1xf32>
    %cst_2 = arith.constant 9.99999997E-7 : f32
    %6 = vector.broadcast %cst_2 : f32 to vector<128x1xf32>
    %7 = arith.addf %5, %6 : vector<128x1xf32>
    %8 = math.rsqrt %7 : vector<128x1xf32>
    %9 = vector.broadcast %8 : vector<128x1xf32> to vector<128x128xf32>
    %10 = arith.mulf %0, %9 : vector<128x128xf32>
    %c0_3 = arith.constant 0 : index
    %c0_4 = arith.constant 0 : index
    %11 = vector.load %arg2[%c0_3, %c0_4] : memref<1x128xf32, #tpu.memory_space<vmem>>, vector<1x128xf32>
    %12 = vector.broadcast %11 : vector<1x128xf32> to vector<128x128xf32>
    %13 = arith.mulf %10, %12 : vector<128x128xf32>
    %14 = arith.truncf %13 : vector<128x128xf32> to vector<128x128xbf16>
    %c0_5 = arith.constant 0 : index
    %c0_6 = arith.constant 0 : index
    %15 = vector.load %arg3[%c0_5, %c0_6] : memref<128x384xbf16, #tpu.memory_space<vmem>>, vector<128x384xbf16>
    %cst_7 = arith.constant dense<0.000000e+00> : vector<128x384xf32>
    %16 = tpu.matmul %14, %15, %cst_7 {dimension_numbers = #tpu.dot_dimension_numbers<[1], [0], [0], [1], [0, 0, 1, 1], [], []>} : vector<128x128xbf16>, vector<128x384xbf16>, vector<128x384xf32> -> vector<128x384xf32>
    %c0_8 = arith.constant 0 : index
    %c0_9 = arith.constant 0 : index
    %17 = vector.load %arg4[%c0_8, %c0_9] : memref<1x384xf32, #tpu.memory_space<vmem>>, vector<1x384xf32>
    %18 = vector.broadcast %17 : vector<1x384xf32> to vector<128x384xf32>
    %19 = arith.addf %16, %18 : vector<128x384xf32>
    %20 = arith.truncf %19 : vector<128x384xf32> to vector<128x384xbf16>
    %c0_10 = arith.constant 0 : index
    %c0_11 = arith.constant 0 : index
    %21 = vector.load %arg5[%c0_10, %c0_11] : memref<128x384xbf16, #tpu.memory_space<vmem>>, vector<128x384xbf16>
    tpu.vector_store %arg5[%c0_10, %c0_11], %20 {strides = array<i32>} : memref<128x384xbf16, #tpu.memory_space<vmem>>, vector<128x384xbf16>,
    return
  }
  func.func @transform_0(%arg0: i32) -> (i32, i32) {
    %c0_i32 = arith.constant 0 : i32
    %c0_i32_0 = arith.constant 0 : i32
    return %arg0, %c0_i32 : i32, i32
  }
  func.func @transform_1(%arg0: i32) -> (i32, i32) {
    %c0_i32 = arith.constant 0 : i32
    %c0_i32_0 = arith.constant 0 : i32
    %c0_i32_1 = arith.constant 0 : i32
    return %c0_i32, %c0_i32_0 : i32, i32
  }
  func.func @transform_2(%arg0: i32) -> (i32, i32) {
    %c0_i32 = arith.constant 0 : i32
    %c0_i32_0 = arith.constant 0 : i32
    %c0_i32_1 = arith.constant 0 : i32
    return %c0_i32, %c0_i32_0 : i32, i32
  }
  func.func @transform_3(%arg0: i32) -> (i32, i32) {
    %c0_i32 = arith.constant 0 : i32
    %c0_i32_0 = arith.constant 0 : i32
    %c0_i32_1 = arith.constant 0 : i32
    return %c0_i32, %c0_i32_0 : i32, i32
  }
  func.func @transform_4(%arg0: i32) -> (i32, i32) {
    %c0_i32 = arith.constant 0 : i32
    %c0_i32_0 = arith.constant 0 : i32
    return %arg0, %c0_i32 : i32, i32
  }
}

</mosaic_0001>

<bundles_post_ra>
// kernel: tpu_custom_call.1
= control target key start
LH: loop header
LB: loop body
LE: loop exit
PB: predicated region body
PF: predicated region fallthrough
CT: control target
= control target key end

     0   :  { %9 = vsyncpa [#allocation3], 0  ;;  %s2309_s0 = inlined_call_operand.hbm [shape: f32[256,128], index: 0, kind: input, shape index: {}]   ;;  %s2310_s1 = inlined_call_operand.hbm [shape: f32[1,128], index: 1, kind: input, shape index: {}]   ;;  %s2311_s2 = inlined_call_operand.hbm [shape: bf16[128,384], index: 2, kind: input, shape index: {}]   ;;  %s2312_s3 = inlined_call_operand.hbm [shape: f32[1,384], index: 3, kind: input, shape index: {}]   ;;  %s2313_s4 = inlined_call_operand.hbm [shape: bf16[256,384], index: 4, kind: output, shape index: {}]  }
   0x1   :  { %11 = vsyncpa [#allocation3 + $0x1], 0 }
   0x2   :  { %12 = vsyncpa [#allocation6], 0 }
   0x3   :  { %13 = vsyncpa [#allocation9], 0 }
   0x4   :  { %14 = vsyncpa [#allocation4], 0 }
   0x5   :  { %16 = vsyncpa [#allocation4 + $0x1], 0  ;;  %s1587_s15 = smov 0   ;;  %s1589_s16 = smov 0  }
   0x6   :  { %s1591_s17 = smov 0   ;;  %s1593_s18 = smov 0  }
   0x7 LB: > { %s1608_s19 = sadd.s32 4294967295, %s1550_s18   ;;  %s1071_s20 = sadd.s32 4294967294, %s1550_s18   ;;  %s1550_s18 = sphi %s1593_s18, %s2346_s18   ;;  %s1546_s17 = sphi %s1591_s17, %s2345_s17   ;;  %s1542_s16 = sphi %s1589_s16, %s2344_s16   ;;  %s1538_s15 = sphi %s1587_s15, %s2343_s15  }
   0x8   : > { %p42_p0 = scmp.ne.s32.totalorder %s1542_s16, %s1538_s15  ;;  %p43_p1 = scmp.eq.s32.totalorder %s1608_s19, 0 }
   0x9   : > { %p129_p2 = scmp.eq.s32.totalorder %s1608_s19, 1  ;;  %p135_p3 = scmp.eq.s32.totalorder %s1071_s20, 1 }
   0xa   : > { %p1617_p4 = por %p43_p1, %p42_p0  ;;  %p1072_p5 = scmp.ge.s32.totalorder %s1550_s18, 1 }
   0xb   : > { %p1622_p6 = por %p135_p3, %p42_p0  ;;  %p142_p7 = scmp.lt.s32.totalorder %s1550_s18, 3 }
   0xc   : > { %s154_s25 = sshll.u32 %s2310_s1, 4  ;;  %s1552_s27 = smov [#allocation5]   ;;  %s155_s25 = int_to_ptr.hbm [resolvable:$true] %s154_s25 }
   0xd   : > { %p1630_p8 = pnand %p1072_p5, %p142_p7  ;;  %s156_s28 = sshll.u32 %s1552_s27, 4  ;;  %s157_s28 = int_to_ptr.vmem [resolvable:$true] %s156_s28 }
   0xe   : > { %s165_s5 = sshll.u32 %s2311_s2, 4  ;;  %s1553_s7 = smov [#allocation7]   ;;  %s166_s5 = int_to_ptr.hbm [resolvable:$true] %s165_s5 }
   0xf   : > { %p1253_p10 = pneg %p1630_p8  ;;  %s167_s8 = sshll.u32 %s1553_s7, 4  ;;  %s168_s8 = int_to_ptr.vmem [resolvable:$true] %s167_s8 }
  0x10   : > { %s1554_s9 = smov 192   ;;  %s1555_s10 = smov 12  }
  0x11   : > { %p1642_p11 = pnand %p1253_p10, %p43_p1  ;;  %s180_s13 = sshll.u32 %s2312_s3, 4  ;;  %s181_s13 = int_to_ptr.hbm [resolvable:$true] %s180_s13 }
  0x12   : > { %s1556_s14 = smov [#allocation8]   ;;  %s1656_s23 = sadd.s32 1, %s1550_s18  }
  0x13   : > { %1256 = dma.hbm_to_vmem [thread:$0]  (!%p1642_p11), %s155_s25, 16, %s157_s28, [#allocation6]  }
  0x14   : > { %1259 = dma.hbm_to_vmem [thread:$0]  (!%p1642_p11), %s166_s5, 3072, %s168_s8, [#allocation6], %s1554_s9, %s1554_s9, %s1555_s10  }
  0x15   : > { %s182_s20 = sshll.u32 %s1556_s14, 4  ;;  %s26_s24 = ssub.s32 %s1550_s18, %s1656_s23  ;;  %s183_s20 = int_to_ptr.vmem [resolvable:$true] %s182_s20 }
  0x16   : > { %1262 = dma.hbm_to_vmem [thread:$0]  (!%p1642_p11), %s181_s13, 48, %s183_s20, [#allocation9]  }
  0x17   : > { %s29_s25 = sadd.s32 1, %s1546_s17  ;;  %p27_p12 = scmp.eq.s32.totalorder %s26_s24, 0 }
  0x18   : > { %p36_p13 = scmp.ne.s32.totalorder %s1546_s17, %s1542_s16  ;;  %p37_p0 = scmp.eq.s32.totalorder %s1550_s18, 0 }
  0x19   : > { %p1274_p3 = scmp.lt.s32.totalorder %s1550_s18, 2  ;;  %s193_s29 = sand.u32 1, %s1546_s17  }
  0x1a   : > { %s1666_s27 = scalar_select %p27_p12, %s1546_s17, %s29_s25  }
  0x1b   : > { %p38_p5 = por %p37_p0, %p36_p13  ;;  %p1670_p7 = por %p129_p2, %p36_p13 }
  0x1c   : > { %s1186_s30 = sshll.u32 %s1550_s18, 7  ;;  %s1077_s5 = sshll.u32 %s193_s29, 7 }
  0x1d   : > { %s202_s8 = scalar_lea.hbm %s2309_s0, %s1186_s30  ;;  %s197_s10 = scalar_lea.vmem [#allocation2], %s1077_s5 }
  0x1e   : > { %s203_s9 = sshll.u32 %s202_s8, 4  ;;  %s205_s11 = sshll.u32 %s197_s10, 4  ;;  %s204_s9 = int_to_ptr.hbm [resolvable:$true] %s203_s9  ;;  %s206_s11 = int_to_ptr.vmem [resolvable:$true] %s205_s11 }
  0x1f   : > { %p1681_p10 = pnand %p1274_p3, %p38_p5  ;;  %s194_s13 = scalar_lea.sflag [#allocation3], %s193_s29 }
  0x20   : > { %s1446_s14 = sshra.s32 %s204_s9, 4  ;;  %s1453_s30 = scalar_lea.hbm %s2309_s0, 256  ;;  %s1447_s14 = int_to_ptr.hbm [resolvable:$true] %s1446_s14 }
  0x21   : > { %s1448_s20 = scalar_lea.hbm %s1447_s14, 128  ;;  %p1450_p11 = pneg %p1681_p10 }
  0x22   : > { %p1449_p2 = scmp.ne.s32.totalorder %s1447_s14, %s1448_s20  ;;  %p1454_p0 = scmp.lt.s32.totalorder %s1447_s14, %s2309_s0 }
  0x23   : > { %p1455_p3 = scmp.lt.s32.totalorder %s1453_s30, %s1448_s20 }
  0x24   : > { %p1451_p12 = pnand %p1450_p11, %p1449_p2 }
  0x25   : > { %p1456_p5 = por %p1455_p3, %p1454_p0 }
  0x26   : > { %p1452_p13 = pneg %p1451_p12 }
  0x28   : > { %p1457_p9 = pnand %p1456_p5, %p1452_p13 }
  0x2a   : > { %1460 = shalt.err (!%p1457_p9)
}
  0x2b   : > { %s1557_s29 = smov 128   ;;  %s1558_s7 = smov 8  }
  0x2c   : > { %1266 = dma.hbm_to_vmem [thread:$0]  (!%p1681_p10), %s204_s9, 2048, %s206_s11, %s194_s13, %s1557_s29, %s1557_s29, %s1558_s7  }
  0x2d   : > { %217 = sbr.rel (%p1630_p8) target bundleno = 441 (0x1b9), region = 36  ;;  %s1698_s8 = sand.u32 (!%p1630_p8), 1, %s1542_s16  }
  0x2e   : > { %s1081_s10 = sshll.u32 (!%p1630_p8), %s1698_s8, 7  ;;  %s220_s14 = scalar_lea.sflag (!%p1630_p8), [#allocation3], %s1698_s8 }
  0x2f   : > { %s1702_s20 = scalar_lea.vmem (!%p1630_p8), [#allocation2], %s1081_s10 }
  0x32   : > { %1521 = dma.done.wait (%p1617_p4), %s220_s14, 2048  }
  0x33   : > { %1523 = vsyncadd (%p1617_p4), %s220_s14, 4294965248 }
  0x34   : > { %1525 = dma.done.wait (%p43_p1), [#allocation6], 3088  }
  0x35   : > { %1527 = vsyncadd (%p43_p1), [#allocation6], 4294964208 }
  0x36   : > { %1529 = dma.done.wait (%p43_p1), [#allocation9], 48  }
  0x37   : > { %1531 = vsyncadd (%p43_p1), [#allocation9], 4294967248  ;;  %v1717_v0 = vld [vmem:[%s1702_s20 + $0x60] sm:$0xff]  ;;  %v1720_v1 = vld [vmem:[%s1702_s20 + $0x10] sm:$0xff]  ;;  %v1559_v32 = vmov 128.0   ;;  %s1235_s21 = smul.u32 192, %s1698_s8 }
  0x38   : > { %v1723_v2 = vld [vmem:[%s1702_s20] sm:$0xff]  ;;  %v294_v3 = vmul.f32 %v1717_v0, %v1717_v0  ;;  %v284_v4 = vmul.f32 %v1720_v1, %v1720_v1  ;;  %v1732_v6 = vld [vmem:[%s1702_s20 + $0x68] sm:$0xff]  ;;  %v1735_v7 = vld [vmem:[%s1702_s20 + $0x18] sm:$0xff]  ;;  %1322 = vrcp.f32 %v1559_v32  ;;  %s1236_s9 = smul.u32 192, %s1608_s19  ;;  %s953_s25 = scalar_lea.sflag [#allocation4], %s1698_s8 }
  0x39   : > { %v282_v5 = vmul.f32 %v1723_v2, %v1723_v2  ;;  %v1738_v8 = vld [vmem:[%s1702_s20 + $0x8] sm:$0xff]  ;;  %v295_v9 = vmul.f32 %v1732_v6, %v1732_v6  ;;  %v285_v10 = vmul.f32 %v1735_v7, %v1735_v7  ;;  %v1747_v12 = vld [vmem:[%s1702_s20 + $0x78] sm:$0xff]  ;;  %v1750_v13 = vld [vmem:[%s1702_s20 + $0x20] sm:$0xff]  ;;  %s2195_s26 = scalar_lea.vmem [#allocation10], %s1235_s21  ;;  %s1496_s7 = scalar_lea.hbm %s2313_s4, 384 }
  0x3a   : > { %322 = vadd.xlane.f32.xlu1 %v294_v3  ;;  %302 = vadd.xlane.f32.xlu2 %v284_v4  ;;  %v283_v11 = vmul.f32 %v1738_v8, %v1738_v8  ;;  %v1753_v14 = vld [vmem:[%s1702_s20 + $0x70] sm:$0xff]  ;;  %v297_v15 = vmul.f32 %v1747_v12, %v1747_v12  ;;  %v286_v16 = vmul.f32 %v1750_v13, %v1750_v13  ;;  %v1765_v19 = vld [vmem:[%s1702_s20 + $0x38] sm:$0xff]  ;;  %v1768_v20 = vld [vmem:[%s1702_s20 + $0x28] sm:$0xff]  ;;  %s965_s13 = scalar_lea.hbm %s2313_s4, %s1236_s9  ;;  %s966_s19 = sshll.u32 %s2195_s26, 4  ;;  %s967_s19 = int_to_ptr.vmem [resolvable:$true] %s966_s19 }
  0x3b   : > { %298 = vadd.xlane.f32.xlu0 %v282_v5  ;;  %v296_v17 = vmul.f32 %v1753_v14, %v1753_v14  ;;  %v1762_v18 = vld [vmem:[%s1702_s20 + $0x30] sm:$0xff]  ;;  %v289_v22 = vmul.f32 %v1765_v19, %v1765_v19  ;;  %v287_v23 = vmul.f32 %v1768_v20, %v1768_v20  ;;  %v1777_v24 = vld [vmem:[%s1702_s20 + $0x48] sm:$0xff]  ;;  %v1783_v26 = vld [vmem:[%s1702_s20 + $0x40] sm:$0xff]  ;;  %s968_s24 = sshll.u32 %s965_s13, 4  ;;  %s969_s24 = int_to_ptr.hbm [resolvable:$true] %s968_s24 }
  0x3c   : > { %v288_v21 = vmul.f32 %v1762_v18, %v1762_v18  ;;  %v1780_v25 = vld [vmem:[%s1702_s20 + $0x50] sm:$0xff]  ;;  %v291_v27 = vmul.f32 %v1777_v24, %v1777_v24  ;;  %v290_v29 = vmul.f32 %v1783_v26, %v1783_v26  ;;  %v1792_v30 = vld [vmem:[%s1702_s20 + $0x58] sm:$0xff]  ;;  %v1171_v33 = vld [vmem:[#allocation7 + $0xa8] sm:$0xf]  ;;  %s1490_s30 = sshra.s32 %s969_s24, 4  ;;  %s1491_s30 = int_to_ptr.hbm [resolvable:$true] %s1490_s30 }
  0x3d   : > { %v292_v28 = vmul.f32 %v1780_v25, %v1780_v25  ;;  %v293_v31 = vmul.f32 %v1792_v30, %v1792_v30  ;;  %v1209_v34 = vld [vmem:[#allocation7 + $0xb0] sm:$0xf0]  ;;  %v1208_v35 = vld [vmem:[#allocation7 + $0xac] sm:$0xf]  ;;  %v1173_v37 = vld [vmem:[#allocation7 + $0xb4] sm:$0xf0]  ;;  %p1497_p9 = scmp.lt.s32.totalorder %s1491_s30, %s2313_s4 }
  0x3e   : > { %v1172_v36 = vor.u32 %v1209_v34, %v1171_v33  ;;  %v1179_v38 = vld [vmem:[#allocation7 + $0xb0] sm:$0xf]  ;;  %v1210_v39 = vld [vmem:[#allocation7 + $0xb8] sm:$0xf0]  ;;  %v1796_v40 = vor.u32 %v1208_v35, %v1173_v37  ;;  %v1802_v42 = vpop.eup %1322  ;;  %v1205_v45 = vld [vmem:[#allocation7 + $0x94] sm:$0xf] }
  0x3f   : > { %v1798_v41 = vor.u32 %v1210_v39, %v1179_v38  ;;  %v1159_v43 = vld [vmem:[#allocation7 + $0x90] sm:$0xf]  ;;  %v1206_v44 = vld [vmem:[#allocation7 + $0x98] sm:$0xf0]  ;;  %v1161_v47 = vld [vmem:[#allocation7 + $0x9c] sm:$0xf0]  ;;  %vm335_vm0 = vweird.f32 %v1802_v42 }
  0x40   : > { %741 = vmatpush.bf16.msra.mxu0 %v1172_v36  ;;  %1211 = vmatpush.bf16.msra.mxu3 %v1172_v36  ;;  %v1160_v46 = vor.u32 %v1206_v44, %v1159_v43  ;;  %v1167_v48 = vld [vmem:[#allocation7 + $0x98] sm:$0xf]  ;;  %v1207_v49 = vld [vmem:[#allocation7 + $0xa0] sm:$0xf0]  ;;  %v1804_v50 = vor.u32 %v1205_v45, %v1161_v47  ;;  %v331_v52 = vmul.f32 128.0, %v1802_v42  ;;  %s1492_s5 = scalar_lea.hbm %s1491_s30, 192 }
  0x41   : > { %790 = vmatpush.bf16.msra.mxu1 %v1796_v40  ;;  %839 = vmatpush.bf16.msra.mxu2 %v1798_v41  ;;  %v1806_v51 = vor.u32 %v1207_v49, %v1167_v48  ;;  %v1147_v53 = vld [vmem:[#allocation7 + $0x78] sm:$0xf]  ;;  %v1203_v54 = vld [vmem:[#allocation7 + $0x80] sm:$0xf0]  ;;  %v1202_v55 = vld [vmem:[#allocation7 + $0x7c] sm:$0xf]  ;;  %p1493_p1 = scmp.ne.s32.totalorder %s1491_s30, %s1492_s5  ;;  %p1498_p10 = scmp.lt.s32.totalorder %s1496_s7, %s1492_s5 }
  0x42   : > { %324 = vadd.xlane.f32.xlu1 %v295_v9  ;;  %304 = vadd.xlane.f32.xlu2 %v285_v10  ;;  %v1148_v56 = vor.u32 %v1203_v54, %v1147_v53  ;;  %v1149_v57 = vld [vmem:[#allocation7 + $0x84] sm:$0xf0]  ;;  %v1155_v58 = vld [vmem:[#allocation7 + $0x80] sm:$0xf]  ;;  %v1204_v59 = vld [vmem:[#allocation7 + $0x88] sm:$0xf0] }
  0x43   : > { %300 = vadd.xlane.f32.xlu0 %v283_v11  ;;  %v1811_v60 = vor.u32 %v1202_v55, %v1149_v57  ;;  %v1813_v61 = vor.u32 %v1204_v59, %v1155_v58  ;;  %v332_v62 = vsub.f32 1.0, %v331_v52  ;;  %v1135_v63 = vld [vmem:[#allocation7 + $0x60] sm:$0xf]  ;;  %v1200_v3 = vld [vmem:[#allocation7 + $0x68] sm:$0xf0]  ;;  %p1494_p4 = pnand %p1493_p1, %p1670_p7  ;;  %p1499_p2 = por %p1498_p10, %p1497_p9 }
  0x44   : > { %742 = vmatpush.bf16.msra.mxu0 %v1160_v46  ;;  %1212 = vmatpush.bf16.msra.mxu3 %v1160_v46  ;;  %v1199_v4 = vld [vmem:[#allocation7 + $0x64] sm:$0xf]  ;;  %v1136_v5 = vor.u32 %v1200_v3, %v1135_v63  ;;  %v1137_v9 = vld [vmem:[#allocation7 + $0x6c] sm:$0xf0]  ;;  %v1143_v10 = vld [vmem:[#allocation7 + $0x68] sm:$0xf] }
  0x45   : > { %791 = vmatpush.bf16.msra.mxu1 %v1804_v50  ;;  %840 = vmatpush.bf16.msra.mxu2 %v1806_v51  ;;  %v1201_v11 = vld [vmem:[#allocation7 + $0x70] sm:$0xf0]  ;;  %v1111_v35 = vld [vmem:[#allocation7 + $0x30] sm:$0xf]  ;;  %v1194_v36 = vld [vmem:[#allocation7 + $0x38] sm:$0xf0]  ;;  %p1495_p8 = pneg %p1494_p4 }
  0x46   : > { %v1193_v37 = vld [vmem:[#allocation7 + $0x34] sm:$0xf]  ;;  %v1112_v38 = vor.u32 %v1194_v36, %v1111_v35  ;;  %v1113_v39 = vld [vmem:[#allocation7 + $0x3c] sm:$0xf0]  ;;  %v1119_v43 = vld [vmem:[#allocation7 + $0x38] sm:$0xf] }
  0x47   : > { %v1195_v44 = vld [vmem:[#allocation7 + $0x40] sm:$0xf0]  ;;  %v1835_v46 = vor.u32 %v1193_v37, %v1113_v39  ;;  %v1099_v52 = vld [vmem:[#allocation7 + $0x18] sm:$0xf]  ;;  %v1190_v54 = vld [vmem:[#allocation7 + $0x1c] sm:$0xf]  ;;  %p1500_p11 = pnand %p1499_p2, %p1495_p8 }
  0x48   : > { %743 = vmatpush.bf16.msra.mxu0 %v1148_v56  ;;  %1213 = vmatpush.bf16.msra.mxu3 %v1148_v56  ;;  %v1837_v47 = vor.u32 %v1195_v44, %v1119_v43  ;;  %v1191_v53 = vld [vmem:[#allocation7 + $0x20] sm:$0xf0]  ;;  %v1101_v58 = vld [vmem:[#allocation7 + $0x24] sm:$0xf0]  ;;  %v1107_v59 = vld [vmem:[#allocation7 + $0x20] sm:$0xf] }
  0x49   : > { %792 = vmatpush.bf16.msra.mxu1 %v1811_v60  ;;  %841 = vmatpush.bf16.msra.mxu2 %v1813_v61  ;;  %v1100_v57 = vor.u32 %v1191_v53, %v1099_v52  ;;  %v1844_v3 = vor.u32 %v1190_v54, %v1101_v58 }
  0x4a   : > { %328 = vadd.xlane.f32.xlu1 %v297_v15  ;;  %306 = vadd.xlane.f32.xlu2 %v286_v16  ;;  %v333_v15 = vmul.f32 %v1802_v42, %v332_v62  ;;  %v1818_v16 = vor.u32 %v1199_v4, %v1137_v9  ;;  %v1192_v62 = vld [vmem:[#allocation7 + $0x28] sm:$0xf0] }
  0x4b   : > { %326 = vadd.xlane.f32.xlu0 %v296_v17  ;;  %v1820_v17 = vor.u32 %v1201_v11, %v1143_v10  ;;  %v1846_v4 = vor.u32 %v1192_v62, %v1107_v59  ;;  %v1087_v11 = vld [vmem:[#allocation7] sm:$0xf] }
  0x4c   : > { %744 = vmatpush.bf16.msra.mxu0 %v1136_v5  ;;  %1214 = vmatpush.bf16.msra.mxu3 %v1136_v5  ;;  %v334_v32 = vadd.f32 %v1802_v42, %v333_v15  ;;  %v1188_v15 = vld [vmem:[#allocation7 + $0x8] sm:$0xf0] }
  0x4d   : > { %793 = vmatpush.bf16.msra.mxu1 %v1818_v16  ;;  %842 = vmatpush.bf16.msra.mxu2 %v1820_v17 }
  0x4e   : > { %v1833_v45 = vsel %vm335_vm0, %v1802_v42, %v334_v32 }
  0x52   : > { %310 = vadd.xlane.f32.xlu1 %v288_v21  ;;  %312 = vadd.xlane.f32.xlu2 %v289_v22  ;;  %v1123_v21 = vld [vmem:[#allocation7 + $0x48] sm:$0xf]  ;;  %v1197_v22 = vld [vmem:[#allocation7 + $0x50] sm:$0xf0] }
  0x53   : > { %308 = vadd.xlane.f32.xlu0 %v287_v23  ;;  %v1196_v23 = vld [vmem:[#allocation7 + $0x4c] sm:$0xf] }
  0x5a   : > { %316 = vadd.xlane.f32.xlu1 %v291_v27  ;;  %318 = vadd.xlane.f32.xlu2 %v292_v28  ;;  %v1124_v27 = vor.u32 %v1197_v22, %v1123_v21  ;;  %v1125_v28 = vld [vmem:[#allocation7 + $0x54] sm:$0xf0]  ;;  %v1088_v21 = vor.u32 %v1188_v15, %v1087_v11  ;;  %v1187_v22 = vld [vmem:[#allocation7 + $0x4] sm:$0xf] }
  0x5b   : > { %314 = vadd.xlane.f32.xlu0 %v290_v29  ;;  %v1131_v29 = vld [vmem:[#allocation7 + $0x50] sm:$0xf]  ;;  %v1825_v33 = vor.u32 %v1196_v23, %v1125_v28 }
  0x5c   : > { %745 = vmatpush.bf16.msra.mxu0 %v1124_v27  ;;  %1215 = vmatpush.bf16.msra.mxu3 %v1124_v27  ;;  %v1089_v23 = vld [vmem:[#allocation7 + $0xc] sm:$0xf0]  ;;  %v1095_v27 = vld [vmem:[#allocation7 + $0x8] sm:$0xf] }
  0x5d   : > { %794 = vmatpush.bf16.msra.mxu1 %v1825_v33  ;;  %v1857_v28 = vor.u32 %v1187_v22, %v1089_v23 }
  0x60   : > { %746 = vmatpush.bf16.msra.mxu0 %v1112_v38  ;;  %1216 = vmatpush.bf16.msra.mxu3 %v1112_v38 }
  0x61   : > { %795 = vmatpush.bf16.msra.mxu1 %v1835_v46 }
  0x63   : > { %320 = vadd.xlane.f32.xlu0 %v293_v31  ;;  %v1198_v31 = vld [vmem:[#allocation7 + $0x58] sm:$0xf0] }
  0x64   : > { %v1827_v34 = vor.u32 %v1198_v31, %v1131_v29  ;;  %747 = vmatpush.bf16.msra.mxu0 %v1100_v57  ;;  %1217 = vmatpush.bf16.msra.mxu3 %v1100_v57  ;;  %v1189_v29 = vld [vmem:[#allocation7 + $0x10] sm:$0xf0] }
  0x65   : > { %796 = vmatpush.bf16.msra.mxu1 %v1844_v3  ;;  %v1860_v31 = vor.u32 %v1189_v29, %v1095_v27 }
  0x66   : > { %843 = vmatpush.bf16.msra.mxu2 %v1827_v34 }
  0x68   : > { %748 = vmatpush.bf16.msra.mxu0 %v1088_v21  ;;  %1218 = vmatpush.bf16.msra.mxu3 %v1088_v21 }
  0x69   : > { %797 = vmatpush.bf16.msra.mxu1 %v1857_v28 }
  0x6a   : > { %844 = vmatpush.bf16.msra.mxu2 %v1837_v47 }
  0x6c   : > { %1219 = vmatpush.bf16.msrb.mxu3 %v1796_v40 }
  0x6e   : > { %845 = vmatpush.bf16.msra.mxu2 %v1846_v4 }
  0x70   : > { %1220 = vmatpush.bf16.msrb.mxu3 %v1804_v50 }
  0x72   : > { %846 = vmatpush.bf16.msra.mxu2 %v1860_v31 }
  0x74   : > { %1221 = vmatpush.bf16.msrb.mxu3 %v1811_v60 }
  0x78   : > { %1222 = vmatpush.bf16.msrb.mxu3 %v1818_v16 }
  0x7c   : > { %1223 = vmatpush.bf16.msrb.mxu3 %v1825_v33 }
  0x80   : > { %1224 = vmatpush.bf16.msrb.mxu3 %v1835_v46 }
  0x84   : > { %1225 = vmatpush.bf16.msrb.mxu3 %v1844_v3 }
  0x88   : > { %1226 = vmatpush.bf16.msrb.mxu3 %v1857_v28 }
  0xad   : > { %v323_v48 = vpop.xlane.xlu1 %322  ;;  %v303_v49 = vpop.xlane.xlu2 %302 }
  0xae   : > { %v349_v55 = vmul.f32 %v1833_v45, %v323_v48  ;;  %v339_v42 = vmul.f32 %v1833_v45, %v303_v49  ;;  %v299_v56 = vpop.xlane.xlu0 %298 }
  0xaf   : > { %v337_v63 = vmul.f32 %v1833_v45, %v299_v56 }
  0xb0   : > { %v1848_v5 = vadd.f32 1e-06, %v349_v55  ;;  %v1850_v9 = vadd.f32 1e-06, %v339_v42 }
  0xb1   : > { %v1852_v10 = vadd.f32 1e-06, %v337_v63 }
  0xb2   : > { %1324 = vrsqrt.f32 %v1848_v5  ;;  %vm495_vm2 = vweird.f32 %v1848_v5  ;;  %vm395_vm10 = vweird.f32 %v1850_v9 }
  0xb3   : > { %1326 = vrsqrt.f32 %v1852_v10  ;;  %vm375_vm5 = vweird.f32 %v1852_v10 }
  0xb4   : > { %1328 = vrsqrt.f32 %v1850_v9 }
  0xb5   : > { %v325_v32 = vpop.xlane.xlu1 %324  ;;  %v305_v35 = vpop.xlane.xlu2 %304 }
  0xb6   : > { %v350_v36 = vmul.f32 %v1833_v45, %v325_v32  ;;  %v340_v37 = vmul.f32 %v1833_v45, %v305_v35  ;;  %v301_v38 = vpop.xlane.xlu0 %300 }
  0xb7   : > { %v338_v39 = vmul.f32 %v1833_v45, %v301_v38 }
  0xb8   : > { %v1869_v43 = vpop.eup %1324  ;;  %v1871_v44 = vadd.f32 1e-06, %v350_v36  ;;  %v1873_v48 = vadd.f32 1e-06, %v340_v37 }
  0xb9   : > { %v490_v49 = vmul.f32 %v1869_v43, %v1848_v5  ;;  %v1877_v52 = vadd.f32 1e-06, %v338_v39  ;;  %v1880_v40 = vpop.eup %1326  ;;  %vm496_vm1 = vweird.f32 %v1869_v43 }
  0xba   : > { %1330 = vrsqrt.f32 %v1871_v44  ;;  %v1883_v53 = vpop.eup %1328  ;;  %v370_v55 = vmul.f32 %v1880_v40, %v1852_v10  ;;  %vm376_vm3 = vweird.f32 %v1880_v40  ;;  %vm1923_vm4 = vmor %vm495_vm2, %vm496_vm1  ;;  %vm505_vm6 = vweird.f32 %v1871_v44 }
  0xbb   : > { %v491_v54 = vmul.f32 %v1869_v43, %v490_v49  ;;  %1332 = vrsqrt.f32 %v1873_v48  ;;  %v390_v50 = vmul.f32 %v1883_v53, %v1850_v9  ;;  %vm1932_vm8 = vmor %vm375_vm5, %vm376_vm3  ;;  %vm385_vm12 = vweird.f32 %v1877_v52 }
  0xbc   : > { %1334 = vrsqrt.f32 %v1877_v52  ;;  %v371_v56 = vmul.f32 %v1880_v40, %v370_v55  ;;  %vm396_vm13 = vweird.f32 %v1883_v53  ;;  %vm405_vm14 = vweird.f32 %v1873_v48 }
  0xbd   : > { %v492_v42 = vmul.f32 0.5, %v491_v54  ;;  %v329_v57 = vpop.xlane.xlu1 %328  ;;  %v307_v62 = vpop.xlane.xlu2 %306  ;;  %v391_v35 = vmul.f32 %v1883_v53, %v390_v50  ;;  %vm1997_vm3 = vmor %vm395_vm10, %vm396_vm13 }
  0xbe   : > { %v352_v58 = vmul.f32 %v1833_v45, %v329_v57  ;;  %v327_v59 = vpop.xlane.xlu0 %326  ;;  %v372_v11 = vmul.f32 0.5, %v371_v56  ;;  %v341_v60 = vmul.f32 %v1833_v45, %v307_v62 }
  0xbf   : > { %v493_v63 = vsub.f32 1.5, %v492_v42  ;;  %v351_v29 = vmul.f32 %v1833_v45, %v327_v59  ;;  %v392_v5 = vmul.f32 0.5, %v391_v35 }
  0xc0   : > { %v1331_v15 = vpop.eup %1330  ;;  %v1895_v21 = vadd.f32 1e-06, %v352_v58  ;;  %v373_v23 = vsub.f32 1.5, %v372_v11  ;;  %v1920_v56 = vadd.f32 1e-06, %v341_v60 }
  0xc1   : > { %v1897_v22 = vpop.eup %1332  ;;  %v500_v27 = vmul.f32 %v1331_v15, %v1871_v44  ;;  %v494_v37 = vmul.f32 %v1869_v43, %v493_v63  ;;  %v1918_v42 = vadd.f32 1e-06, %v351_v29  ;;  %vm506_vm7 = vweird.f32 %v1331_v15  ;;  %v1955_v60 = vld [vmem:[#allocation5] ss:$0 sm:$0xff] }
  0xc2   : > { %v1903_v32 = vpop.eup %1334  ;;  %v400_v36 = vmul.f32 %v1897_v22, %v1873_v48  ;;  %1336 = vrsqrt.f32 %v1895_v21  ;;  %v374_v16 = vmul.f32 %v1880_v40, %v373_v23  ;;  %vm507_vm11 = vmor %vm505_vm6, %vm506_vm7  ;;  %vm406_vm0 = vweird.f32 %v1897_v22 }
  0xc3   : > { %v501_v38 = vmul.f32 %v1331_v15, %v500_v27  ;;  %v380_v39 = vmul.f32 %v1903_v32, %v1877_v52  ;;  %v498_v58 = vsel %vm1923_vm4, %v1869_v43, %v494_v37  ;;  %1338 = vrsqrt.f32 %v1918_v42  ;;  %vm2009_vm4 = vmor %vm405_vm14, %vm406_vm0 }
  0xc4   : > { %v401_v49 = vmul.f32 %v1897_v22, %v400_v36  ;;  %v378_v10 = vsel %vm1932_vm8, %v1880_v40, %v374_v16  ;;  %vm386_vm9 = vweird.f32 %v1903_v32  ;;  %1340 = vrsqrt.f32 %v1920_v56 }
  0xc5   : > { %v502_v54 = vmul.f32 0.5, %v501_v38  ;;  %v381_v55 = vmul.f32 %v1903_v32, %v380_v39  ;;  %v541_v35 = vmul.f32 %v498_v58, %v1717_v0  ;;  %v311_v36 = vpop.xlane.xlu1 %310  ;;  %v529_v39 = vmul.f32 %v378_v10, %v1723_v2  ;;  %vm387_vm15 = vmor %vm385_vm12, %vm386_vm9 }
  0xc6   : > { %v309_v50 = vpop.xlane.xlu0 %308  ;;  %v402_v11 = vmul.f32 0.5, %v401_v49  ;;  %v393_v52 = vsub.f32 1.5, %v392_v5  ;;  %v343_v58 = vmul.f32 %v1833_v45, %v311_v36  ;;  %vm525_vm1 = vweird.f32 %v1895_v21 }
  0xc7   : > { %v503_v33 = vsub.f32 1.5, %v502_v54  ;;  %v382_v62 = vmul.f32 0.5, %v381_v55  ;;  %v342_v23 = vmul.f32 %v1833_v45, %v309_v50  ;;  %v313_v54 = vpop.xlane.xlu2 %312  ;;  %v561_v57 = vmul.f32 %v1955_v60, %v541_v35 }
  0xc8   : > { %v1937_v63 = vpop.eup %1336  ;;  %vm515_vm6 = vweird.f32 %v1918_v42  ;;  %vm415_vm9 = vweird.f32 %v1920_v56 }
  0xc9   : > { %v504_v43 = vmul.f32 %v1331_v15, %v503_v33  ;;  %v383_v27 = vsub.f32 1.5, %v382_v62  ;;  %v520_v29 = vmul.f32 %v1937_v63, %v1895_v21  ;;  %v1953_v40 = vadd.f32 1e-06, %v342_v23  ;;  %v1967_v0 = vpop.eup %1338 }
  0xca   : > { %v510_v2 = vmul.f32 %v1967_v0, %v1918_v42  ;;  %v394_v62 = vmul.f32 %v1883_v53, %v393_v52  ;;  %vm526_vm2 = vweird.f32 %v1937_v63  ;;  %vm516_vm7 = vweird.f32 %v1967_v0 }
  0xcb   : > { %v508_v37 = vsel %vm507_vm11, %v1331_v15, %v504_v43  ;;  %v384_v38 = vmul.f32 %v1903_v32, %v383_v27  ;;  %v521_v46 = vmul.f32 %v1937_v63, %v520_v29  ;;  %1342 = vrsqrt.f32 %v1953_v40  ;;  %vm2022_vm5 = vmor %vm525_vm1, %vm526_vm2 }
  0xcc   : > { %v542_v44 = vmul.f32 %v508_v37, %v1732_v6  ;;  %v403_v15 = vsub.f32 1.5, %v402_v11  ;;  %v1976_v6 = vpop.eup %1340  ;;  %v511_v3 = vmul.f32 %v1967_v0, %v510_v2  ;;  %v398_v42 = vsel %vm1997_vm3, %v1883_v53, %v394_v62  ;;  %vm517_vm8 = vmor %vm515_vm6, %vm516_vm7 }
  0xcd   : > { %v388_v16 = vsel %vm387_vm15, %v1903_v32, %v384_v38  ;;  %v522_v49 = vmul.f32 0.5, %v521_v46  ;;  %v549_v32 = vmul.f32 %v1955_v60, %v529_v39  ;;  %v410_v35 = vmul.f32 %v1976_v6, %v1920_v56  ;;  %v317_v28 = vpop.xlane.xlu1 %316 }
  0xce   : > { %v530_v55 = vmul.f32 %v388_v16, %v1738_v8  ;;  %v562_v50 = vmul.f32 %v1955_v60, %v542_v44  ;;  %v344_v8 = vmul.f32 %v1833_v45, %v313_v54  ;;  %v315_v11 = vpop.xlane.xlu0 %314  ;;  %v404_v27 = vmul.f32 %v1897_v22, %v403_v15 }
  0xcf   : > { %v523_v5 = vsub.f32 1.5, %v522_v49  ;;  %v512_v29 = vmul.f32 0.5, %v511_v3  ;;  %v2015_v38 = vadd.f32 1e-06, %v343_v58  ;;  %v346_v21 = vmul.f32 %v1833_v45, %v317_v28  ;;  %v319_v52 = vpop.xlane.xlu2 %318 }
  0xd0   : > { %v550_v59 = vmul.f32 %v1955_v60, %v530_v55  ;;  %v1983_v33 = vpack.c.bf16 %v562_v50, %v561_v57  ;;  %v2028_v39 = vadd.f32 1e-06, %v344_v8  ;;  %v345_v44 = vmul.f32 %v1833_v45, %v315_v11 }
  0xd1   : > { %v524_v10 = vmul.f32 %v1937_v63, %v523_v5  ;;  %v1991_v23 = vpop.eup %1342  ;;  %v513_v48 = vsub.f32 1.5, %v512_v29  ;;  %v408_v15 = vsel %vm2009_vm4, %v1897_v22, %v404_v27  ;;  %v411_v49 = vmul.f32 %v1976_v6, %v410_v35 }
  0xd2   : > { %v565_v36 = vpack.c.bf16 %v550_v59, %v549_v32  ;;  %779 = vmatmul.bf16.vlgmr.msra.gmra.mxu3 %v1983_v33  ;;  %v420_v37 = vmul.f32 %v1991_v23, %v1953_v40  ;;  %1344 = vrsqrt.f32 %v2015_v38  ;;  %v2045_v54 = vadd.f32 1e-06, %v346_v21 }
  0xd3   : > { %1227 = vmatpush.bf16.msra.mxu3 %v1798_v41  ;;  %v528_v41 = vsel %vm2022_vm5, %v1937_v63, %v524_v10  ;;  %v514_v16 = vmul.f32 %v1967_v0, %v513_v48  ;;  %v2047_v2 = vadd.f32 1e-06, %v345_v44  ;;  %1346 = vrsqrt.f32 %v2028_v39 }
  0xd4   : > { %749 = vmatmul.bf16.vlgmr.msra.gmra.mxu0 %v565_v36  ;;  %798 = vmatmul.bf16.vlgmr.msra.gmra.mxu1 %v565_v36  ;;  %v421_v63 = vmul.f32 %v1991_v23, %v420_v37  ;;  %v544_v22 = vmul.f32 %v528_v41, %v1747_v12  ;;  %v347_v55 = vmul.f32 %v1833_v45, %v319_v52  ;;  %v412_v5 = vmul.f32 0.5, %v411_v49 }
  0xd5   : > { %847 = vmatmul.bf16.vlgmr.msra.gmra.mxu2 %v565_v36  ;;  %v518_v53 = vsel %vm517_vm8, %v1967_v0, %v514_v16  ;;  %v532_v32 = vmul.f32 %v408_v15, %v1735_v7  ;;  %1348 = vrsqrt.f32 %v2045_v54  ;;  %v531_v3 = vmul.f32 %v398_v42, %v1720_v1 }
  0xd6   : > { %v543_v57 = vmul.f32 %v518_v53, %v1753_v14  ;;  %v321_v50 = vpop.xlane.xlu0 %320  ;;  %v422_v58 = vmul.f32 0.5, %v421_v63  ;;  %1350 = vrsqrt.f32 %v2047_v2  ;;  %v564_v12 = vmul.f32 %v1955_v60, %v544_v22 }
  0xd7   : > { %1228 = vmatpush.bf16.msra.mxu3 %v1806_v51  ;;  %v2062_v0 = vadd.f32 1e-06, %v347_v55  ;;  %v348_v14 = vmul.f32 %v1833_v45, %v321_v50  ;;  %v413_v8 = vsub.f32 1.5, %v412_v5  ;;  %v552_v62 = vmul.f32 %v1955_v60, %v532_v32 }
  0xd8   : > { %v563_v51 = vmul.f32 %v1955_v60, %v543_v57  ;;  %v2065_v59 = vpop.eup %1344  ;;  %v423_v1 = vsub.f32 1.5, %v422_v58  ;;  %vm425_vm10 = vweird.f32 %v1953_v40  ;;  %vm416_vm11 = vweird.f32 %v1976_v6 }
  0xd9   : > { %v2067_v7 = vpop.eup %1346  ;;  %1352 = vrsqrt.f32 %v2062_v0  ;;  %v430_v45 = vmul.f32 %v2065_v59, %v2015_v38  ;;  %v551_v11 = vmul.f32 %v1955_v60, %v531_v3  ;;  %vm426_vm12 = vweird.f32 %v1991_v23  ;;  %vm2092_vm13 = vmor %vm415_vm9, %vm416_vm11 }
  0xda   : > { %v2080_v43 = vpack.c.bf16 %v564_v12, %v563_v51  ;;  %v440_v29 = vmul.f32 %v2067_v7, %v2028_v39  ;;  %v424_v37 = vmul.f32 %v1991_v23, %v423_v1  ;;  %vm2102_vm14 = vmor %vm425_vm10, %vm426_vm12  ;;  %vm465_vm15 = vweird.f32 %v2045_v54 }
  0xdb   : > { %1229 = vmatpush.bf16.msra.mxu3 %v1813_v61  ;;  %v2073_v61 = vadd.f32 1e-06, %v348_v14  ;;  %v1349_v10 = vpop.eup %1348  ;;  %v566_v36 = vpack.c.bf16 %v552_v62, %v551_v11  ;;  %v431_v21 = vmul.f32 %v2065_v59, %v430_v45  ;;  %vm455_vm1 = vweird.f32 %v2047_v2 }
  0xdc   : > { %v1351_v27 = vpop.eup %1350  ;;  %v460_v35 = vmul.f32 %v1349_v10, %v2045_v54  ;;  %v441_v44 = vmul.f32 %v2067_v7, %v440_v29  ;;  %vm466_vm0 = vweird.f32 %v1349_v10  ;;  %v428_v16 = vsel %vm2102_vm14, %v1991_v23, %v424_v37 }
  0xdd   : > { %1354 = vrsqrt.f32 %v2073_v61  ;;  %v450_v28 = vmul.f32 %v1351_v27, %v2047_v2  ;;  %vm456_vm2 = vweird.f32 %v1351_v27  ;;  %v432_v53 = vmul.f32 0.5, %v431_v21  ;;  %vm2122_vm3 = vmor %vm465_vm15, %vm466_vm0 }
  0xde   : > { %v461_v46 = vmul.f32 %v1349_v10, %v460_v35  ;;  %v442_v55 = vmul.f32 0.5, %v441_v44  ;;  %vm2127_vm4 = vmor %vm455_vm1, %vm456_vm2  ;;  %v534_v32 = vmul.f32 %v428_v16, %v1768_v20  ;;  %vm475_vm5 = vweird.f32 %v2062_v0 }
  0xdf   : > { %1230 = vmatpush.bf16.msra.mxu3 %v1820_v17  ;;  %v414_v17 = vmul.f32 %v1976_v6, %v413_v8  ;;  %v2098_v48 = vpop.eup %1352  ;;  %v451_v56 = vmul.f32 %v1351_v27, %v450_v28  ;;  %vm485_vm7 = vweird.f32 %v2073_v61  ;;  %v433_v45 = vsub.f32 1.5, %v432_v53 }
  0xe0   : > { %v462_v52 = vmul.f32 0.5, %v461_v46  ;;  %vm476_vm6 = vweird.f32 %v2098_v48  ;;  %v554_v8 = vmul.f32 %v1955_v60, %v534_v32  ;;  %v443_v11 = vsub.f32 1.5, %v442_v55 }
  0xe1   : > { %v418_v40 = vsel %vm2092_vm13, %v1976_v6, %v414_v17  ;;  %v452_v42 = vmul.f32 0.5, %v451_v56  ;;  %vm2148_vm9 = vmor %vm475_vm5, %vm476_vm6  ;;  %vm435_vm11 = vweird.f32 %v2015_v38  ;;  %vm436_vm12 = vweird.f32 %v2065_v59 }
  0xe2   : > { %784 = vmatmul.bf16.gmra.mxu3 %v2080_v43  ;;  %v463_v49 = vsub.f32 1.5, %v462_v52  ;;  %v533_v23 = vmul.f32 %v418_v40, %v1750_v13  ;;  %vm445_vm13 = vweird.f32 %v2028_v39  ;;  %vm446_vm14 = vweird.f32 %v2067_v7  ;;  %vm437_vm15 = vmor %vm435_vm11, %vm436_vm12 }
  0xe3   : > { %1231 = vmatpush.bf16.msra.mxu3 %v1827_v34  ;;  %v470_v34 = vmul.f32 %v2098_v48, %v2062_v0  ;;  %v1355_v15 = vpop.eup %1354  ;;  %v453_v6 = vsub.f32 1.5, %v452_v42  ;;  %v434_v38 = vmul.f32 %v2065_v59, %v433_v45  ;;  %v444_v35 = vmul.f32 %v2067_v7, %v443_v11  ;;  %vm447_vm0 = vmor %vm445_vm13, %vm446_vm14 }
  0xe4   : > { %754 = vmatmul.bf16.gmra.mxu0 %v566_v36  ;;  %803 = vmatmul.bf16.gmra.mxu1 %v566_v36  ;;  %v480_v2 = vmul.f32 %v1355_v15, %v2073_v61  ;;  %v464_v57 = vmul.f32 %v1349_v10, %v463_v49  ;;  %vm486_vm8 = vweird.f32 %v1355_v15  ;;  %v553_v12 = vmul.f32 %v1955_v60, %v533_v23 }
  0xe5   : > { %852 = vmatmul.bf16.gmra.mxu2 %v566_v36  ;;  %v471_v63 = vmul.f32 %v2098_v48, %v470_v34  ;;  %vm2155_vm10 = vmor %vm485_vm7, %vm486_vm8  ;;  %v438_v36 = vsel %vm437_vm15, %v2065_v59, %v434_v38  ;;  %v448_v28 = vsel %vm447_vm0, %v2067_v7, %v444_v35 }
  0xe6   : > { %v481_v54 = vmul.f32 %v1355_v15, %v480_v2  ;;  %v468_v58 = vsel %vm2122_vm3, %v1349_v10, %v464_v57  ;;  %v567_v29 = vpack.c.bf16 %v554_v8, %v553_v12  ;;  %v536_v41 = vmul.f32 %v448_v28, %v1765_v19 }
  0xe7   : > { %1232 = vmatpush.bf16.msra.mxu3 %v1837_v47  ;;  %v472_v5 = vmul.f32 0.5, %v471_v63  ;;  %v454_v47 = vmul.f32 %v1351_v27, %v453_v6  ;;  %v538_v20 = vmul.f32 %v468_v58, %v1777_v24 }
  0xe8   : > { %v482_v51 = vmul.f32 0.5, %v481_v54  ;;  %v556_v56 = vmul.f32 %v1955_v60, %v536_v41 }
  0xe9   : > { %v473_v3 = vsub.f32 1.5, %v472_v5  ;;  %v458_v13 = vsel %vm2127_vm4, %v1351_v27, %v454_v47  ;;  %v558_v10 = vmul.f32 %v1955_v60, %v538_v20 }
  0xea   : > { %v537_v14 = vmul.f32 %v458_v13, %v1783_v26 }
  0xeb   : > { %1233 = vmatpush.bf16.msra.mxu3 %v1846_v4  ;;  %v474_v62 = vmul.f32 %v2098_v48, %v473_v3  ;;  %v483_v4 = vsub.f32 1.5, %v482_v51 }
  0xec   : > { %v557_v26 = vmul.f32 %v1955_v60, %v537_v14 }
  0xed   : > { %v484_v0 = vmul.f32 %v1355_v15, %v483_v4  ;;  %v478_v61 = vsel %vm2148_vm9, %v2098_v48, %v474_v62  ;;  %v535_v48 = vmul.f32 %v438_v36, %v1762_v18  ;;  %v605_v18 = vld [vmem:[#allocation8] sm:$0x7] }
  0xee   : > { %v569_v27 = vpack.c.bf16 %v558_v10, %v557_v26  ;;  %v539_v39 = vmul.f32 %v478_v61, %v1780_v25  ;;  %v2186_v19 = vperm.slane %v605_v18, 0  ;;  %v2193_v34 = vperm.slane %v605_v18, 2 }
  0xef   : > { %1234 = vmatpush.bf16.msra.mxu3 %v1860_v31  ;;  %v488_v31 = vsel %vm2155_vm10, %v1355_v15, %v484_v0  ;;  %v555_v21 = vmul.f32 %v1955_v60, %v535_v48 }
  0xf0   : > { %v540_v17 = vmul.f32 %v488_v31, %v1792_v30  ;;  %v559_v9 = vmul.f32 %v1955_v60, %v539_v39  ;;  %v2188_v30 = vperm.slane %v605_v18, 1 }
  0xf1   : > { %v568_v25 = vpack.c.bf16 %v556_v56, %v555_v21 }
  0xf2   : > { %828 = vmatmul.bf16.vlgmr.msrb.gmra.mxu3 %v1983_v33  ;;  %v560_v37 = vmul.f32 %v1955_v60, %v540_v17 }
  0xf4   : > { %759 = vmatmul.bf16.gmra.mxu0 %v567_v29  ;;  %808 = vmatmul.bf16.gmra.mxu1 %v567_v29  ;;  %v570_v46 = vpack.c.bf16 %v560_v37, %v559_v9 }
  0xf5   : > { %857 = vmatmul.bf16.gmra.mxu2 %v567_v29 }
 0x102   : > { %833 = vmatmul.bf16.gmra.mxu3 %v2080_v43 }
 0x104   : > { %764 = vmatmul.bf16.gmra.mxu0 %v568_v25  ;;  %813 = vmatmul.bf16.gmra.mxu1 %v568_v25 }
 0x105   : > { %862 = vmatmul.bf16.gmra.mxu2 %v568_v25 }
 0x112   : > { %877 = vmatmul.bf16.vlgmr.msra.gmra.mxu3 %v1983_v33 }
 0x114   : > { %769 = vmatmul.bf16.gmra.mxu0 %v569_v27  ;;  %818 = vmatmul.bf16.gmra.mxu1 %v569_v27 }
 0x115   : > { %867 = vmatmul.bf16.gmra.mxu2 %v569_v27 }
 0x122   : > { %882 = vmatmul.bf16.gmra.mxu3 %v2080_v43 }
 0x124   : > { %774 = vmatmul.bf16.gmra.mxu0 %v570_v46  ;;  %823 = vmatmul.bf16.gmra.mxu1 %v570_v46 }
 0x125   : > { %872 = vmatmul.bf16.gmra.mxu2 %v570_v46 }
 0x151   : > { %v750_v60 = vpop.f32.mrf.mxu0  ;;  %v799_v59 = vpop.f32.mrf.mxu1 }
 0x152   : > { %v751_v7 = vadd.f32 %v750_v60, %v2186_v19  ;;  %v800_v33 = vadd.f32 %v799_v59, %v2188_v30 }
 0x154   : > { %v888_v44 = vpack.c.bf16 %v800_v33, %v751_v7 }
 0x155   : > { %v780_v52 = vpop.f32.mrf.mxu3 }
 0x156   : > { %920 = vst [vmem:[%s2195_s26] sm:$0xff] %v888_v44  ;;  %v781_v27 = vadd.f32 %v780_v52, %v2186_v19 }
 0x158   : > { %v848_v43 = vpop.f32.mrf.mxu2 }
 0x159   : > { %v849_v40 = vadd.f32 %v848_v43, %v2193_v34  ;;  %v752_v42 = vpop.f32.mrf.mxu0  ;;  %v801_v15 = vpop.f32.mrf.mxu1 }
 0x15a   : > { %v753_v16 = vadd.f32 %v752_v42, %v2186_v19  ;;  %v802_v49 = vadd.f32 %v801_v15, %v2188_v30 }
 0x15b   : > { %v889_v63 = vpack.c.bf16 %v849_v40, %v849_v40 }
 0x15c   : > { %v890_v53 = vpack.c.bf16 %v802_v49, %v753_v16 }
 0x15d   : > { %921 = vst [vmem:[%s2195_s26 + $0x8] sm:$0xf] %v889_v63  ;;  %v782_v22 = vpop.f32.mrf.mxu3 }
 0x15e   : > { %922 = vst [vmem:[%s2195_s26 + $0xc] sm:$0xff] %v890_v53  ;;  %v783_v46 = vadd.f32 %v782_v22, %v2186_v19 }
 0x160   : > { %v850_v6 = vpop.f32.mrf.mxu2 }
 0x161   : > { %v851_v2 = vadd.f32 %v850_v6, %v2193_v34  ;;  %v755_v55 = vpop.f32.mrf.mxu0  ;;  %v804_v57 = vpop.f32.mrf.mxu1 }
 0x162   : > { %v756_v50 = vadd.f32 %v755_v55, %v2186_v19  ;;  %v805_v23 = vadd.f32 %v804_v57, %v2188_v30 }
 0x163   : > { %v891_v5 = vpack.c.bf16 %v851_v2, %v851_v2 }
 0x164   : > { %v892_v47 = vpack.c.bf16 %v805_v23, %v756_v50 }
 0x165   : > { %923 = vst [vmem:[%s2195_s26 + $0x14] sm:$0xf] %v891_v5  ;;  %v785_v32 = vpop.f32.mrf.mxu3 }
 0x166   : > { %924 = vst [vmem:[%s2195_s26 + $0x18] sm:$0xff] %v892_v47  ;;  %v786_v52 = vadd.f32 %v785_v32, %v2186_v19 }
 0x168   : > { %v853_v54 = vpop.f32.mrf.mxu2 }
 0x169   : > { %v854_v58 = vadd.f32 %v853_v54, %v2193_v34  ;;  %v757_v3 = vpop.f32.mrf.mxu0  ;;  %v806_v13 = vpop.f32.mrf.mxu1 }
 0x16a   : > { %v758_v51 = vadd.f32 %v757_v3, %v2186_v19  ;;  %v807_v20 = vadd.f32 %v806_v13, %v2188_v30 }
 0x16b   : > { %v893_v12 = vpack.c.bf16 %v854_v58, %v854_v58 }
 0x16c   : > { %v894_v14 = vpack.c.bf16 %v807_v20, %v758_v51 }
 0x16d   : > { %925 = vst [vmem:[%s2195_s26 + $0x20] sm:$0xf] %v893_v12  ;;  %v787_v8 = vpop.f32.mrf.mxu3 }
 0x16e   : > { %926 = vst [vmem:[%s2195_s26 + $0x24] sm:$0xff] %v894_v14  ;;  %v788_v55 = vadd.f32 %v787_v8, %v2186_v19 }
 0x170   : > { %v855_v62 = vpop.f32.mrf.mxu2 }
 0x171   : > { %v856_v1 = vadd.f32 %v855_v62, %v2193_v34  ;;  %v760_v4 = vpop.f32.mrf.mxu0  ;;  %v809_v10 = vpop.f32.mrf.mxu1 }
 0x172   : > { %v761_v45 = vadd.f32 %v760_v4, %v2186_v19  ;;  %v810_v11 = vadd.f32 %v809_v10, %v2188_v30 }
 0x173   : > { %v895_v24 = vpack.c.bf16 %v856_v1, %v856_v1 }
 0x174   : > { %v896_v26 = vpack.c.bf16 %v810_v11, %v761_v45 }
 0x175   : > { %927 = vst [vmem:[%s2195_s26 + $0x2c] sm:$0xf] %v895_v24  ;;  %v829_v0 = vpop.f32.mrf.mxu3 }
 0x176   : > { %928 = vst [vmem:[%s2195_s26 + $0x30] sm:$0xff] %v896_v26  ;;  %v830_v29 = vadd.f32 %v829_v0, %v2188_v30 }
 0x178   : > { %v912_v61 = vpack.c.bf16 %v830_v29, %v781_v27  ;;  %v858_v31 = vpop.f32.mrf.mxu2 }
 0x179   : > { %v859_v38 = vadd.f32 %v858_v31, %v2193_v34  ;;  %v762_v35 = vpop.f32.mrf.mxu0  ;;  %v811_v39 = vpop.f32.mrf.mxu1 }
 0x17a   : > { %944 = vst [vmem:[%s2195_s26 + $0x90] sm:$0xff] %v912_v61  ;;  %v763_v17 = vadd.f32 %v762_v35, %v2186_v19  ;;  %v812_v36 = vadd.f32 %v811_v39, %v2188_v30 }
 0x17b   : > { %v897_v28 = vpack.c.bf16 %v859_v38, %v859_v38 }
 0x17c   : > { %v898_v9 = vpack.c.bf16 %v812_v36, %v763_v17 }
 0x17d   : > { %929 = vst [vmem:[%s2195_s26 + $0x38] sm:$0xf] %v897_v28  ;;  %v831_v37 = vpop.f32.mrf.mxu3 }
 0x17e   : > { %930 = vst [vmem:[%s2195_s26 + $0x3c] sm:$0xff] %v898_v9  ;;  %v832_v48 = vadd.f32 %v831_v37, %v2188_v30 }
 0x180   : > { %v914_v41 = vpack.c.bf16 %v832_v48, %v783_v46  ;;  %v860_v21 = vpop.f32.mrf.mxu2 }
 0x181   : > { %v861_v56 = vadd.f32 %v860_v21, %v2193_v34  ;;  %v765_v25 = vpop.f32.mrf.mxu0  ;;  %v814_v18 = vpop.f32.mrf.mxu1 }
 0x182   : > { %946 = vst [vmem:[%s2195_s26 + $0x9c] sm:$0xff] %v914_v41  ;;  %v766_v60 = vadd.f32 %v765_v25, %v2186_v19  ;;  %v815_v59 = vadd.f32 %v814_v18, %v2188_v30 }
 0x183   : > { %v899_v7 = vpack.c.bf16 %v861_v56, %v861_v56 }
 0x184   : > { %v900_v33 = vpack.c.bf16 %v815_v59, %v766_v60 }
 0x185   : > { %931 = vst [vmem:[%s2195_s26 + $0x44] sm:$0xf] %v899_v7  ;;  %v834_v44 = vpop.f32.mrf.mxu3 }
 0x186   : > { %932 = vst [vmem:[%s2195_s26 + $0x48] sm:$0xff] %v900_v33  ;;  %v835_v43 = vadd.f32 %v834_v44, %v2188_v30 }
 0x188   : > { %v916_v40 = vpack.c.bf16 %v835_v43, %v786_v52  ;;  %v863_v42 = vpop.f32.mrf.mxu2 }
 0x189   : > { %v864_v15 = vadd.f32 %v863_v42, %v2193_v34  ;;  %v767_v16 = vpop.f32.mrf.mxu0  ;;  %v816_v49 = vpop.f32.mrf.mxu1 }
 0x18a   : > { %948 = vst [vmem:[%s2195_s26 + $0xa8] sm:$0xff] %v916_v40  ;;  %v768_v63 = vadd.f32 %v767_v16, %v2186_v19  ;;  %v817_v53 = vadd.f32 %v816_v49, %v2188_v30 }
 0x18b   : > { %v901_v22 = vpack.c.bf16 %v864_v15, %v864_v15 }
 0x18c   : > { %v902_v6 = vpack.c.bf16 %v817_v53, %v768_v63 }
 0x18d   : > { %933 = vst [vmem:[%s2195_s26 + $0x50] sm:$0xf] %v901_v22  ;;  %v836_v2 = vpop.f32.mrf.mxu3 }
 0x18e   : > { %934 = vst [vmem:[%s2195_s26 + $0x54] sm:$0xff] %v902_v6  ;;  %v837_v57 = vadd.f32 %v836_v2, %v2188_v30 }
 0x190   : > { %v918_v50 = vpack.c.bf16 %v837_v57, %v788_v55  ;;  %v865_v23 = vpop.f32.mrf.mxu2 }
 0x191   : > { %v866_v5 = vadd.f32 %v865_v23, %v2193_v34  ;;  %v770_v47 = vpop.f32.mrf.mxu0  ;;  %v819_v32 = vpop.f32.mrf.mxu1 }
 0x192   : > { %950 = vst [vmem:[%s2195_s26 + $0xb4] sm:$0xff] %v918_v50  ;;  %v771_v54 = vadd.f32 %v770_v47, %v2186_v19  ;;  %v820_v58 = vadd.f32 %v819_v32, %v2188_v30 }
 0x193   : > { %v903_v3 = vpack.c.bf16 %v866_v5, %v866_v5 }
 0x194   : > { %v904_v13 = vpack.c.bf16 %v820_v58, %v771_v54 }
 0x195   : > { %935 = vst [vmem:[%s2195_s26 + $0x5c] sm:$0xf] %v903_v3  ;;  %v878_v51 = vpop.f32.mrf.mxu3 }
 0x196   : > { %936 = vst [vmem:[%s2195_s26 + $0x60] sm:$0xff] %v904_v13  ;;  %v879_v20 = vadd.f32 %v878_v51, %v2193_v34 }
 0x198   : > { %v868_v12 = vpop.f32.mrf.mxu2  ;;  %v913_v14 = vpack.c.bf16 %v879_v20, %v879_v20 }
 0x199   : > { %v869_v8 = vadd.f32 %v868_v12, %v2193_v34  ;;  %v772_v62 = vpop.f32.mrf.mxu0  ;;  %v821_v1 = vpop.f32.mrf.mxu1 }
 0x19a   : > { %945 = vst [vmem:[%s2195_s26 + $0x98] sm:$0xf] %v913_v14  ;;  %v773_v4 = vadd.f32 %v772_v62, %v2186_v19  ;;  %v822_v10 = vadd.f32 %v821_v1, %v2188_v30 }
 0x19b   : > { %v905_v45 = vpack.c.bf16 %v869_v8, %v869_v8 }
 0x19c   : > { %v906_v11 = vpack.c.bf16 %v822_v10, %v773_v4 }
 0x19d   : > { %937 = vst [vmem:[%s2195_s26 + $0x68] sm:$0xf] %v905_v45  ;;  %v880_v24 = vpop.f32.mrf.mxu3 }
 0x19e   : > { %938 = vst [vmem:[%s2195_s26 + $0x6c] sm:$0xff] %v906_v11  ;;  %v881_v26 = vadd.f32 %v880_v24, %v2193_v34 }
 0x1a0   : > { %v870_v0 = vpop.f32.mrf.mxu2  ;;  %v915_v27 = vpack.c.bf16 %v881_v26, %v881_v26 }
 0x1a1   : > { %v871_v29 = vadd.f32 %v870_v0, %v2193_v34  ;;  %v775_v61 = vpop.f32.mrf.mxu0  ;;  %v824_v31 = vpop.f32.mrf.mxu1 }
 0x1a2   : > { %947 = vst [vmem:[%s2195_s26 + $0xa4] sm:$0xf] %v915_v27  ;;  %v776_v38 = vadd.f32 %v775_v61, %v2186_v19  ;;  %v825_v35 = vadd.f32 %v824_v31, %v2188_v30 }
 0x1a3   : > { %v907_v39 = vpack.c.bf16 %v871_v29, %v871_v29 }
 0x1a4   : > { %v908_v17 = vpack.c.bf16 %v825_v35, %v776_v38 }
 0x1a5   : > { %939 = vst [vmem:[%s2195_s26 + $0x74] sm:$0xf] %v907_v39  ;;  %v883_v36 = vpop.f32.mrf.mxu3 }
 0x1a6   : > { %940 = vst [vmem:[%s2195_s26 + $0x78] sm:$0xff] %v908_v17  ;;  %v884_v28 = vadd.f32 %v883_v36, %v2193_v34 }
 0x1a8   : > { %v873_v9 = vpop.f32.mrf.mxu2  ;;  %v917_v37 = vpack.c.bf16 %v884_v28, %v884_v28 }
 0x1a9   : > { %v874_v46 = vadd.f32 %v873_v9, %v2193_v34  ;;  %v777_v48 = vpop.f32.mrf.mxu0  ;;  %v826_v41 = vpop.f32.mrf.mxu1 }
 0x1aa   : > { %949 = vst [vmem:[%s2195_s26 + $0xb0] sm:$0xf] %v917_v37  ;;  %v778_v21 = vadd.f32 %v777_v48, %v2186_v19  ;;  %v827_v56 = vadd.f32 %v826_v41, %v2188_v30 }
 0x1ab   : > { %v909_v25 = vpack.c.bf16 %v874_v46, %v874_v46 }
 0x1ac   : > { %v910_v18 = vpack.c.bf16 %v827_v56, %v778_v21 }
 0x1ad   : > { %941 = vst [vmem:[%s2195_s26 + $0x80] sm:$0xf] %v909_v25  ;;  %v885_v60 = vpop.f32.mrf.mxu3 }
 0x1ae   : > { %942 = vst [vmem:[%s2195_s26 + $0x84] sm:$0xff] %v910_v18  ;;  %v886_v59 = vadd.f32 %v885_v60, %v2193_v34 }
 0x1b0   : > { %v875_v7 = vpop.f32.mrf.mxu2  ;;  %v919_v33 = vpack.c.bf16 %v886_v59, %v886_v59 }
 0x1b1   : > { %v876_v19 = vadd.f32 %v875_v7, %v2193_v34 }
 0x1b2   : > { %951 = vst [vmem:[%s2195_s26 + $0xbc] sm:$0xf] %v919_v33 }
 0x1b3   : > { %v911_v30 = vpack.c.bf16 %v876_v19, %v876_v19 }
 0x1b5   : > { %943 = vst [vmem:[%s2195_s26 + $0x8c] sm:$0xf] %v911_v30 }
 0x1b6   : > { %1503 = shalt.err (!%p1500_p11)
}
 0x1b7   : > { %s1560_s8 = smov 192   ;;  %s1561_s20 = smov 12  }
 0x1b8   : > { %1251 = dma.vmem_to_hbm [thread:$0]  (%p1670_p7), %s967_s19, 3072, %s969_s24, %s953_s25, %s1560_s8, %s1560_s8, %s1561_s20  }
 0x1b9 PF: > { %s983_s21 = sand.u32 1, %s1538_s15   ;;  %p2342_p12 = scmp.ge.s32.totalorder %s1550_s18, 2 }
 0x1ba   : > { %s984_s26 = scalar_lea.sflag [#allocation4], %s983_s21 }
 0x1bb   : > { %p1268_p13 = pnand %p2342_p12, %p1622_p6 }
 0x1bd   : > { %p1269_p0 = pneg %p1268_p13 }
 0x1bf   : > { %1533 = dma.done.wait (%p1269_p0), %s984_s26, 3072  }
 0x1c0   : > { %1535 = vsyncadd (%p1269_p0), %s984_s26, 4294964224  ;;  %p19_p3 = scmp.ge.s32.totalorder %s1656_s23, 4   ;;  %s2343_s15 = smov %s1542_s16 }
 0x1c1   : > { %s2344_s16 = smov %s1546_s17  ;;  %s2345_s17 = smov %s1666_s27 }
 0x1c2   : > { %s2346_s18 = smov %s1656_s23  ;;  %21 = sbr.rel (!%p19_p3) target bundleno = 7 (0x7), region = 93 }
 0x1c7   :  { %990 = vsyncpa [#allocation3], 1 }
 0x1c8   :  { %992 = vsyncpa [#allocation3 + $0x1], 1 }
 0x1c9   :  { %993 = vsyncpa [#allocation6], 1 }
 0x1ca   :  { %994 = vsyncpa [#allocation9], 1 }
 0x1cb   :  { %995 = vsyncpa [#allocation4], 1 }
 0x1cc   :  { %997 = vsyncpa [#allocation4 + $0x1], 1 }

</bundles_post_ra>
